<compile_context>
chip_gen: v7x
topology: tpu7x:2x2x1
jax: 0.10.0
libtpu: 0.0.40
codegen_flags: <defaults>
</compile_context>

<pallas_src>
import jax
import jax.numpy as jnp
from jax.experimental import pallas as pl
from jax.experimental.pallas import tpu as pltpu


# --------------------------- fused forward kernel ---------------------------
def fused_net_kernel(xT_ref, wq_ref, bq_ref, wk_ref, bk_ref, wv_ref, bv_ref,
                     wl_ref, bl_ref, g_ref,
                     y_ref, norm_ref, pooled_ref):
    # xT: (TB, H, W)  with H = attn_size (= t+1, tiny), W = bert hidden (lanes)
    xT = xT_ref[...]
    _, H, _ = xT.shape

    wq = wq_ref[...]; wk = wk_ref[...]; wv = wv_ref[...]      # (H, H)
    bq = bq_ref[...]; bk = bk_ref[...]; bv = bv_ref[...]      # (H, 1)

    # nn.Linear over attn_size, expressed in the transposed layout:
    #   qT[b,h,w] = sum_g Wq[h,g] * xT[b,g,w] + bq[h]
    # H is tiny, so this is an unrolled VPU broadcast-MAC over lane-dense
    # (W,) rows instead of a 4-wide MXU matmul; weights used untransposed.
    def proj(wm, bm):
        acc = wm[None, :, 0:1] * xT[:, 0:1, :]                # (TB, H, W)
        for g in range(1, H):
            acc = acc + wm[None, :, g:g + 1] * xT[:, g:g + 1, :]
        return acc + bm[None, :, :]

    qT = proj(wq, bq)
    kT = proj(wk, bk)
    vT = proj(wv, bv)

    # energy = bmm(q^T, k): the one contraction over hidden (K = W) -> MXU.
    energy = jnp.einsum("bhw,bgw->bhg", qT, kT,
                        preferred_element_type=jnp.float32)   # (TB, H, H)

    # softmax(dim=-1); exact divide keeps tight parity with the reference.
    energy = energy - jnp.max(energy, axis=-1, keepdims=True)
    p = jnp.exp(energy)
    attn = p / jnp.sum(p, axis=-1, keepdims=True)             # (TB, H, H)

    # out = bmm(v, attn^T) in the transposed layout: outT = attn @ vT,
    # again an unrolled H-term VPU broadcast-MAC (contraction K = H is tiny).
    outT = attn[:, :, 0:1] * vT[:, 0:1, :]
    for j in range(1, H):
        outT = outT + attn[:, :, j:j + 1] * vT[:, j:j + 1, :]

    gamma = g_ref[0]                                          # SMEM scalar
    full = gamma * outT + xT                                  # (TB, H, W)

    # Net.self_attention_feature: pooled = out.sum(-1)  (sum over attn_size;
    # unrolled adds over the tiny sublane axis -> lane-dense (TB, W) result).
    pooled = full[:, 0, :]
    for h in range(1, H):
        pooled = pooled + full[:, h, :]
    pooled_ref[...] = pooled

    # 'dil' head: y = pooled @ W_last.T + b_last (contraction over hidden).
    y_ref[...] = (jnp.einsum("bw,cw->bc", pooled, wl_ref[...],
                             preferred_element_type=jnp.float32)
                  + bl_ref[...])

    # F.normalize(pooled, dim=1)  (p=2, eps=1e-12)
    nrm = jnp.sqrt(jnp.sum(pooled * pooled, axis=1, keepdims=True))
    norm_ref[...] = pooled / jnp.maximum(nrm, 1e-12)


# ------------------------------- wrapper -------------------------------------
def net_forward(pre_pooled_outputs, params, batch_tile=8):
    """pre_pooled_outputs: (B, hidden, t+1) float32 -- the stacked BERT pooled
    outputs fed to self_attns[t] (PyTorch Self_Attn input layout)."""
    x = pre_pooled_outputs.astype(jnp.float32)
    B, W, H = x.shape
    xT = jnp.transpose(x, (0, 2, 1))       # (B, H, W): hidden on the lane axis
    nclasses = params["w_last"].shape[0]

    # Batch tiling: one grid step per `batch_tile` rows when B divides evenly
    # (grid axis marked "parallel" for megacore sharding); otherwise the whole
    # small batch goes through a single grid step.
    tb = batch_tile if (B % batch_tile == 0 and B > batch_tile) else B
    grid = (B // tb,)

    def rep_spec(shape):
        # Weight/bias blocks: full array, re-presented at every grid step.
        return pl.BlockSpec(shape, lambda i, _n=len(shape): (0,) * _n)

    y, normalized, pooled = pl.pallas_call(
        fused_net_kernel,
        grid=grid,
        out_shape=(jax.ShapeDtypeStruct((B, nclasses), jnp.float32),
                   jax.ShapeDtypeStruct((B, W), jnp.float32),
                   jax.ShapeDtypeStruct((B, W), jnp.float32)),
        in_specs=[pl.BlockSpec((tb, H, W), lambda i: (i, 0, 0)),   # xT
                  rep_spec((H, H)), rep_spec((H, 1)),              # wq, bq
                  rep_spec((H, H)), rep_spec((H, 1)),              # wk, bk
                  rep_spec((H, H)), rep_spec((H, 1)),              # wv, bv
                  rep_spec((nclasses, W)), rep_spec((1, nclasses)),  # head
                  pl.BlockSpec(memory_space=pltpu.MemorySpace.SMEM)],  # gamma
        out_specs=(pl.BlockSpec((tb, nclasses), lambda i: (i, 0)),
                   pl.BlockSpec((tb, W), lambda i: (i, 0)),
                   pl.BlockSpec((tb, W), lambda i: (i, 0))),
        compiler_params=pltpu.CompilerParams(
            dimension_semantics=("parallel",)),
    )(xT,
      params["wq"], params["bq"][:, None],
      params["wk"], params["bk"][:, None],
      params["wv"], params["bv"][:, None],
      params["w_last"], params["b_last"][None, :],
      params["gamma"])

    # nn.Dropout in eval mode == identity.
    return {"y": y, "normalized_pooled_rep": normalized, "pooled": pooled}


# --------------------------- pure-JAX reference ------------------------------
def ref_forward(x, params):
    hp = jax.lax.Precision.HIGHEST
    q = jnp.einsum("bwg,hg->bwh", x, params["wq"], precision=hp) + params["bq"]
    k = jnp.einsum("bwg,hg->bwh", x, params["wk"], precision=hp) + params["bk"]
    v = jnp.einsum("bwg,hg->bwh", x, params["wv"], precision=hp) + params["bv"]
    energy = jnp.einsum("bwh,bwg->bhg", q, k, precision=hp)     # bmm(q^T, k)
    attn = jax.nn.softmax(energy, axis=-1)
    out = jnp.einsum("bwh,bgh->bwg", v, attn, precision=hp)     # bmm(v, attn^T)
    out = params["gamma"][0] * out + x
    pooled = out.sum(-1)
    y = jnp.einsum("bw,cw->bc", pooled, params["w_last"],
                   precision=hp) + params["b_last"]
    nrm = jnp.sqrt(jnp.sum(pooled * pooled, axis=1, keepdims=True))
    normalized = pooled / jnp.maximum(nrm, 1e-12)
    return {"y": y, "normalized_pooled_rep": normalized, "pooled": pooled}


def _check(out, ref):
    assert jnp.allclose(out["pooled"], ref["pooled"], atol=1e-4, rtol=1e-4)
    assert jnp.allclose(out["y"], ref["y"], atol=1e-4, rtol=1e-4)
    assert jnp.allclose(out["normalized_pooled_rep"],
                        ref["normalized_pooled_rep"], atol=1e-4, rtol=1e-4)


if __name__ == "__main__":
    # Small, forward-consistent shapes: bert_hidden_size -> 128 (lane-dense),
    # current task t = 3 -> attn_size = t+1 = 4, nclasses = 3.
    HIDDEN, T_CUR, NCLASSES = 128, 3, 3
    ATTN = T_CUR + 1

    key = jax.random.PRNGKey(0)
    ks = jax.random.split(key, 10)

    s_attn = 1.0 / jnp.sqrt(jnp.float32(ATTN))
    s_head = 1.0 / jnp.sqrt(jnp.float32(HIDDEN))
    params = {
        "wq": jax.random.uniform(ks[1], (ATTN, ATTN), jnp.float32, -s_attn, s_attn),
        "bq": jax.random.uniform(ks[2], (ATTN,), jnp.float32, -s_attn, s_attn),
        "wk": jax.random.uniform(ks[3], (ATTN, ATTN), jnp.float32, -s_attn, s_attn),
        "bk": jax.random.uniform(ks[4], (ATTN,), jnp.float32, -s_attn, s_attn),
        "wv": jax.random.uniform(ks[5], (ATTN, ATTN), jnp.float32, -s_attn, s_attn),
        "bv": jax.random.uniform(ks[6], (ATTN,), jnp.float32, -s_attn, s_attn),
        # Self_Attn.__init__ sets gamma = zeros(1); use a nonzero value here so
        # the correctness check actually exercises the attention path.
        "gamma": jnp.full((1,), 0.5, jnp.float32),
        # 'dil' head: Linear(bert_hidden_size, nclasses)
        "w_last": jax.random.uniform(ks[7], (NCLASSES, HIDDEN), jnp.float32,
                                     -s_head, s_head),
        "b_last": jax.random.uniform(ks[8], (NCLASSES,), jnp.float32,
                                     -s_head, s_head),
    }

    # Test 1: tiny batch -> single grid step (whole batch in one launch).
    x_small = jax.random.normal(ks[0], (2, HIDDEN, ATTN), dtype=jnp.float32)
    out_small = jax.block_until_ready(net_forward(x_small, params))
    _check(out_small, ref_forward(x_small, params))

    # Test 2: larger batch -> grid over 8-row batch tiles marked "parallel".
    x_big = jax.random.normal(ks[9], (16, HIDDEN, ATTN), dtype=jnp.float32)
    out_big = jax.block_until_ready(net_forward(x_big, params, batch_tile=8))
    _check(out_big, ref_forward(x_big, params))

    print("KERNEL_OK")
</pallas_src>

<mosaic_0001>
module attributes {stable_mosaic.version = 11 : i64} {
  func.func @fused_net_kernel(%arg0: i32, %arg1: memref<2x4x128xf32, #tpu.memory_space<vmem>>, %arg2: memref<4x4xf32, #tpu.memory_space<vmem>>, %arg3: memref<4x1xf32, #tpu.memory_space<vmem>>, %arg4: memref<4x4xf32, #tpu.memory_space<vmem>>, %arg5: memref<4x1xf32, #tpu.memory_space<vmem>>, %arg6: memref<4x4xf32, #tpu.memory_space<vmem>>, %arg7: memref<4x1xf32, #tpu.memory_space<vmem>>, %arg8: memref<3x128xf32, #tpu.memory_space<vmem>>, %arg9: memref<1x3xf32, #tpu.memory_space<vmem>>, %arg10: memref<1xf32, #tpu.memory_space<smem>>, %arg11: memref<2x3xf32, #tpu.memory_space<vmem>>, %arg12: memref<2x128xf32, #tpu.memory_space<vmem>>, %arg13: memref<2x128xf32, #tpu.memory_space<vmem>>) attributes {dimension_semantics = [#tpu.dimension_semantics<parallel>], iteration_bounds = array<i64: 1>, scalar_prefetch = 0 : i64, scratch_operands = 0 : i64, tpu.core_type = #tpu.core_type<tc>, window_params = [{transform_indices = @transform_0, window_bounds = array<i64: 2, 4, 128>}, {pipeline_mode = #tpu.pipeline_mode<synchronous>, transform_indices = @transform_1, window_bounds = array<i64: 4, 4>}, {pipeline_mode = #tpu.pipeline_mode<synchronous>, transform_indices = @transform_2, window_bounds = array<i64: 4, 1>}, {pipeline_mode = #tpu.pipeline_mode<synchronous>, transform_indices = @transform_3, window_bounds = array<i64: 4, 4>}, {pipeline_mode = #tpu.pipeline_mode<synchronous>, transform_indices = @transform_4, window_bounds = array<i64: 4, 1>}, {pipeline_mode = #tpu.pipeline_mode<synchronous>, transform_indices = @transform_5, window_bounds = array<i64: 4, 4>}, {pipeline_mode = #tpu.pipeline_mode<synchronous>, transform_indices = @transform_6, window_bounds = array<i64: 4, 1>}, {pipeline_mode = #tpu.pipeline_mode<synchronous>, transform_indices = @transform_7, window_bounds = array<i64: 3, 128>}, {pipeline_mode = #tpu.pipeline_mode<synchronous>, transform_indices = @transform_8, window_bounds = array<i64: 1, 3>}, {transform_indices = @transform_9, window_bounds = array<i64: 1>}, {transform_indices = @transform_10, window_bounds = array<i64: 2, 3>}, {transform_indices = @transform_11, window_bounds = array<i64: 2, 128>}, {transform_indices = @transform_12, window_bounds = array<i64: 2, 128>}]} {
    %c0 = arith.constant 0 : index
    %c0_0 = arith.constant 0 : index
    %c0_1 = arith.constant 0 : index
    %0 = vector.load %arg1[%c0, %c0_0, %c0_1] : memref<2x4x128xf32, #tpu.memory_space<vmem>>, vector<2x4x128xf32>
    %c0_2 = arith.constant 0 : index
    %c0_3 = arith.constant 0 : index
    %1 = vector.load %arg2[%c0_2, %c0_3] : memref<4x4xf32, #tpu.memory_space<vmem>>, vector<4x4xf32>
    %c0_4 = arith.constant 0 : index
    %c0_5 = arith.constant 0 : index
    %2 = vector.load %arg4[%c0_4, %c0_5] : memref<4x4xf32, #tpu.memory_space<vmem>>, vector<4x4xf32>
    %c0_6 = arith.constant 0 : index
    %c0_7 = arith.constant 0 : index
    %3 = vector.load %arg6[%c0_6, %c0_7] : memref<4x4xf32, #tpu.memory_space<vmem>>, vector<4x4xf32>
    %c0_8 = arith.constant 0 : index
    %c0_9 = arith.constant 0 : index
    %4 = vector.load %arg3[%c0_8, %c0_9] : memref<4x1xf32, #tpu.memory_space<vmem>>, vector<4x1xf32>
    %c0_10 = arith.constant 0 : index
    %c0_11 = arith.constant 0 : index
    %5 = vector.load %arg5[%c0_10, %c0_11] : memref<4x1xf32, #tpu.memory_space<vmem>>, vector<4x1xf32>
    %c0_12 = arith.constant 0 : index
    %c0_13 = arith.constant 0 : index
    %6 = vector.load %arg7[%c0_12, %c0_13] : memref<4x1xf32, #tpu.memory_space<vmem>>, vector<4x1xf32>
    %7 = vector.extract_strided_slice %1 {offsets = [0, 0], sizes = [4, 1], strides = [1, 1]} : vector<4x4xf32> to vector<4x1xf32>
    %8 = vector.shape_cast %7 : vector<4x1xf32> to vector<1x4x1xf32>
    %9 = vector.extract_strided_slice %0 {offsets = [0, 0, 0], sizes = [2, 1, 128], strides = [1, 1, 1]} : vector<2x4x128xf32> to vector<2x1x128xf32>
    %10 = vector.broadcast %8 : vector<1x4x1xf32> to vector<2x4x128xf32>
    %11 = vector.broadcast %9 : vector<2x1x128xf32> to vector<2x4x128xf32>
    %12 = arith.mulf %10, %11 : vector<2x4x128xf32>
    %13 = vector.extract_strided_slice %1 {offsets = [0, 1], sizes = [4, 1], strides = [1, 1]} : vector<4x4xf32> to vector<4x1xf32>
    %14 = vector.shape_cast %13 : vector<4x1xf32> to vector<1x4x1xf32>
    %15 = vector.extract_strided_slice %0 {offsets = [0, 1, 0], sizes = [2, 1, 128], strides = [1, 1, 1]} : vector<2x4x128xf32> to vector<2x1x128xf32>
    %16 = vector.broadcast %14 : vector<1x4x1xf32> to vector<2x4x128xf32>
    %17 = vector.broadcast %15 : vector<2x1x128xf32> to vector<2x4x128xf32>
    %18 = arith.mulf %16, %17 : vector<2x4x128xf32>
    %19 = arith.addf %12, %18 : vector<2x4x128xf32>
    %20 = vector.extract_strided_slice %1 {offsets = [0, 2], sizes = [4, 1], strides = [1, 1]} : vector<4x4xf32> to vector<4x1xf32>
    %21 = vector.shape_cast %20 : vector<4x1xf32> to vector<1x4x1xf32>
    %22 = vector.extract_strided_slice %0 {offsets = [0, 2, 0], sizes = [2, 1, 128], strides = [1, 1, 1]} : vector<2x4x128xf32> to vector<2x1x128xf32>
    %23 = vector.broadcast %21 : vector<1x4x1xf32> to vector<2x4x128xf32>
    %24 = vector.broadcast %22 : vector<2x1x128xf32> to vector<2x4x128xf32>
    %25 = arith.mulf %23, %24 : vector<2x4x128xf32>
    %26 = arith.addf %19, %25 : vector<2x4x128xf32>
    %27 = vector.extract_strided_slice %1 {offsets = [0, 3], sizes = [4, 1], strides = [1, 1]} : vector<4x4xf32> to vector<4x1xf32>
    %28 = vector.shape_cast %27 : vector<4x1xf32> to vector<1x4x1xf32>
    %29 = vector.extract_strided_slice %0 {offsets = [0, 3, 0], sizes = [2, 1, 128], strides = [1, 1, 1]} : vector<2x4x128xf32> to vector<2x1x128xf32>
    %30 = vector.broadcast %28 : vector<1x4x1xf32> to vector<2x4x128xf32>
    %31 = vector.broadcast %29 : vector<2x1x128xf32> to vector<2x4x128xf32>
    %32 = arith.mulf %30, %31 : vector<2x4x128xf32>
    %33 = arith.addf %26, %32 : vector<2x4x128xf32>
    %34 = vector.shape_cast %4 : vector<4x1xf32> to vector<1x4x1xf32>
    %35 = vector.broadcast %34 : vector<1x4x1xf32> to vector<2x4x128xf32>
    %36 = arith.addf %33, %35 : vector<2x4x128xf32>
    %37 = vector.extract_strided_slice %2 {offsets = [0, 0], sizes = [4, 1], strides = [1, 1]} : vector<4x4xf32> to vector<4x1xf32>
    %38 = vector.shape_cast %37 : vector<4x1xf32> to vector<1x4x1xf32>
    %39 = vector.extract_strided_slice %0 {offsets = [0, 0, 0], sizes = [2, 1, 128], strides = [1, 1, 1]} : vector<2x4x128xf32> to vector<2x1x128xf32>
    %40 = vector.broadcast %38 : vector<1x4x1xf32> to vector<2x4x128xf32>
    %41 = vector.broadcast %39 : vector<2x1x128xf32> to vector<2x4x128xf32>
    %42 = arith.mulf %40, %41 : vector<2x4x128xf32>
    %43 = vector.extract_strided_slice %2 {offsets = [0, 1], sizes = [4, 1], strides = [1, 1]} : vector<4x4xf32> to vector<4x1xf32>
    %44 = vector.shape_cast %43 : vector<4x1xf32> to vector<1x4x1xf32>
    %45 = vector.extract_strided_slice %0 {offsets = [0, 1, 0], sizes = [2, 1, 128], strides = [1, 1, 1]} : vector<2x4x128xf32> to vector<2x1x128xf32>
    %46 = vector.broadcast %44 : vector<1x4x1xf32> to vector<2x4x128xf32>
    %47 = vector.broadcast %45 : vector<2x1x128xf32> to vector<2x4x128xf32>
    %48 = arith.mulf %46, %47 : vector<2x4x128xf32>
    %49 = arith.addf %42, %48 : vector<2x4x128xf32>
    %50 = vector.extract_strided_slice %2 {offsets = [0, 2], sizes = [4, 1], strides = [1, 1]} : vector<4x4xf32> to vector<4x1xf32>
    %51 = vector.shape_cast %50 : vector<4x1xf32> to vector<1x4x1xf32>
    %52 = vector.extract_strided_slice %0 {offsets = [0, 2, 0], sizes = [2, 1, 128], strides = [1, 1, 1]} : vector<2x4x128xf32> to vector<2x1x128xf32>
    %53 = vector.broadcast %51 : vector<1x4x1xf32> to vector<2x4x128xf32>
    %54 = vector.broadcast %52 : vector<2x1x128xf32> to vector<2x4x128xf32>
    %55 = arith.mulf %53, %54 : vector<2x4x128xf32>
    %56 = arith.addf %49, %55 : vector<2x4x128xf32>
    %57 = vector.extract_strided_slice %2 {offsets = [0, 3], sizes = [4, 1], strides = [1, 1]} : vector<4x4xf32> to vector<4x1xf32>
    %58 = vector.shape_cast %57 : vector<4x1xf32> to vector<1x4x1xf32>
    %59 = vector.extract_strided_slice %0 {offsets = [0, 3, 0], sizes = [2, 1, 128], strides = [1, 1, 1]} : vector<2x4x128xf32> to vector<2x1x128xf32>
    %60 = vector.broadcast %58 : vector<1x4x1xf32> to vector<2x4x128xf32>
    %61 = vector.broadcast %59 : vector<2x1x128xf32> to vector<2x4x128xf32>
    %62 = arith.mulf %60, %61 : vector<2x4x128xf32>
    %63 = arith.addf %56, %62 : vector<2x4x128xf32>
    %64 = vector.shape_cast %5 : vector<4x1xf32> to vector<1x4x1xf32>
    %65 = vector.broadcast %64 : vector<1x4x1xf32> to vector<2x4x128xf32>
    %66 = arith.addf %63, %65 : vector<2x4x128xf32>
    %67 = vector.extract_strided_slice %3 {offsets = [0, 0], sizes = [4, 1], strides = [1, 1]} : vector<4x4xf32> to vector<4x1xf32>
    %68 = vector.shape_cast %67 : vector<4x1xf32> to vector<1x4x1xf32>
    %69 = vector.extract_strided_slice %0 {offsets = [0, 0, 0], sizes = [2, 1, 128], strides = [1, 1, 1]} : vector<2x4x128xf32> to vector<2x1x128xf32>
    %70 = vector.broadcast %68 : vector<1x4x1xf32> to vector<2x4x128xf32>
    %71 = vector.broadcast %69 : vector<2x1x128xf32> to vector<2x4x128xf32>
    %72 = arith.mulf %70, %71 : vector<2x4x128xf32>
    %73 = vector.extract_strided_slice %3 {offsets = [0, 1], sizes = [4, 1], strides = [1, 1]} : vector<4x4xf32> to vector<4x1xf32>
    %74 = vector.shape_cast %73 : vector<4x1xf32> to vector<1x4x1xf32>
    %75 = vector.extract_strided_slice %0 {offsets = [0, 1, 0], sizes = [2, 1, 128], strides = [1, 1, 1]} : vector<2x4x128xf32> to vector<2x1x128xf32>
    %76 = vector.broadcast %74 : vector<1x4x1xf32> to vector<2x4x128xf32>
    %77 = vector.broadcast %75 : vector<2x1x128xf32> to vector<2x4x128xf32>
    %78 = arith.mulf %76, %77 : vector<2x4x128xf32>
    %79 = arith.addf %72, %78 : vector<2x4x128xf32>
    %80 = vector.extract_strided_slice %3 {offsets = [0, 2], sizes = [4, 1], strides = [1, 1]} : vector<4x4xf32> to vector<4x1xf32>
    %81 = vector.shape_cast %80 : vector<4x1xf32> to vector<1x4x1xf32>
    %82 = vector.extract_strided_slice %0 {offsets = [0, 2, 0], sizes = [2, 1, 128], strides = [1, 1, 1]} : vector<2x4x128xf32> to vector<2x1x128xf32>
    %83 = vector.broadcast %81 : vector<1x4x1xf32> to vector<2x4x128xf32>
    %84 = vector.broadcast %82 : vector<2x1x128xf32> to vector<2x4x128xf32>
    %85 = arith.mulf %83, %84 : vector<2x4x128xf32>
    %86 = arith.addf %79, %85 : vector<2x4x128xf32>
    %87 = vector.extract_strided_slice %3 {offsets = [0, 3], sizes = [4, 1], strides = [1, 1]} : vector<4x4xf32> to vector<4x1xf32>
    %88 = vector.shape_cast %87 : vector<4x1xf32> to vector<1x4x1xf32>
    %89 = vector.extract_strided_slice %0 {offsets = [0, 3, 0], sizes = [2, 1, 128], strides = [1, 1, 1]} : vector<2x4x128xf32> to vector<2x1x128xf32>
    %90 = vector.broadcast %88 : vector<1x4x1xf32> to vector<2x4x128xf32>
    %91 = vector.broadcast %89 : vector<2x1x128xf32> to vector<2x4x128xf32>
    %92 = arith.mulf %90, %91 : vector<2x4x128xf32>
    %93 = arith.addf %86, %92 : vector<2x4x128xf32>
    %94 = vector.shape_cast %6 : vector<4x1xf32> to vector<1x4x1xf32>
    %95 = vector.broadcast %94 : vector<1x4x1xf32> to vector<2x4x128xf32>
    %96 = arith.addf %93, %95 : vector<2x4x128xf32>
    "tpu.trace_start"() <{level = 10 : i32, message = "bhw,bgw->bhg"}> : () -> ()
    %cst = arith.constant dense<0.000000e+00> : vector<2x4x4xf32>
    %97 = tpu.matmul %36, %66, %cst {dimension_numbers = #tpu.dot_dimension_numbers<[2], [2], [1], [1], [0, 0, 0, 1, 1, 1], [0], [0]>} : vector<2x4x128xf32>, vector<2x4x128xf32>, vector<2x4x4xf32> -> vector<2x4x4xf32>
    "tpu.trace_stop"() : () -> ()
    %cst_14 = arith.constant dense<0xFF800000> : vector<2x4xf32>
    %98 = vector.multi_reduction <maximumf>, %97, %cst_14 [2] : vector<2x4x4xf32> to vector<2x4xf32>
    %99 = vector.shape_cast %98 : vector<2x4xf32> to vector<2x4x1xf32>
    %100 = vector.broadcast %99 : vector<2x4x1xf32> to vector<2x4x4xf32>
    %101 = arith.subf %97, %100 : vector<2x4x4xf32>
    %102 = math.exp %101 : vector<2x4x4xf32>
    %cst_15 = arith.constant dense<0.000000e+00> : vector<2x4xf32>
    %103 = vector.multi_reduction <add>, %102, %cst_15 [2] : vector<2x4x4xf32> to vector<2x4xf32>
    %104 = vector.shape_cast %103 : vector<2x4xf32> to vector<2x4x1xf32>
    %105 = vector.broadcast %104 : vector<2x4x1xf32> to vector<2x4x4xf32>
    %106 = arith.divf %102, %105 : vector<2x4x4xf32>
    %107 = vector.extract_strided_slice %106 {offsets = [0, 0, 0], sizes = [2, 4, 1], strides = [1, 1, 1]} : vector<2x4x4xf32> to vector<2x4x1xf32>
    %108 = vector.extract_strided_slice %96 {offsets = [0, 0, 0], sizes = [2, 1, 128], strides = [1, 1, 1]} : vector<2x4x128xf32> to vector<2x1x128xf32>
    %109 = vector.broadcast %107 : vector<2x4x1xf32> to vector<2x4x128xf32>
    %110 = vector.broadcast %108 : vector<2x1x128xf32> to vector<2x4x128xf32>
    %111 = arith.mulf %109, %110 : vector<2x4x128xf32>
    %112 = vector.extract_strided_slice %106 {offsets = [0, 0, 1], sizes = [2, 4, 1], strides = [1, 1, 1]} : vector<2x4x4xf32> to vector<2x4x1xf32>
    %113 = vector.extract_strided_slice %96 {offsets = [0, 1, 0], sizes = [2, 1, 128], strides = [1, 1, 1]} : vector<2x4x128xf32> to vector<2x1x128xf32>
    %114 = vector.broadcast %112 : vector<2x4x1xf32> to vector<2x4x128xf32>
    %115 = vector.broadcast %113 : vector<2x1x128xf32> to vector<2x4x128xf32>
    %116 = arith.mulf %114, %115 : vector<2x4x128xf32>
    %117 = arith.addf %111, %116 : vector<2x4x128xf32>
    %118 = vector.extract_strided_slice %106 {offsets = [0, 0, 2], sizes = [2, 4, 1], strides = [1, 1, 1]} : vector<2x4x4xf32> to vector<2x4x1xf32>
    %119 = vector.extract_strided_slice %96 {offsets = [0, 2, 0], sizes = [2, 1, 128], strides = [1, 1, 1]} : vector<2x4x128xf32> to vector<2x1x128xf32>
    %120 = vector.broadcast %118 : vector<2x4x1xf32> to vector<2x4x128xf32>
    %121 = vector.broadcast %119 : vector<2x1x128xf32> to vector<2x4x128xf32>
    %122 = arith.mulf %120, %121 : vector<2x4x128xf32>
    %123 = arith.addf %117, %122 : vector<2x4x128xf32>
    %124 = vector.extract_strided_slice %106 {offsets = [0, 0, 3], sizes = [2, 4, 1], strides = [1, 1, 1]} : vector<2x4x4xf32> to vector<2x4x1xf32>
    %125 = vector.extract_strided_slice %96 {offsets = [0, 3, 0], sizes = [2, 1, 128], strides = [1, 1, 1]} : vector<2x4x128xf32> to vector<2x1x128xf32>
    %126 = vector.broadcast %124 : vector<2x4x1xf32> to vector<2x4x128xf32>
    %127 = vector.broadcast %125 : vector<2x1x128xf32> to vector<2x4x128xf32>
    %128 = arith.mulf %126, %127 : vector<2x4x128xf32>
    %129 = arith.addf %123, %128 : vector<2x4x128xf32>
    %c0_16 = arith.constant 0 : index
    %130 = memref.load %arg10[%c0_16] : memref<1xf32, #tpu.memory_space<smem>>
    %131 = vector.broadcast %130 : f32 to vector<2x4x128xf32>
    %132 = arith.mulf %131, %129 : vector<2x4x128xf32>
    %133 = arith.addf %132, %0 : vector<2x4x128xf32>
    %134 = vector.extract_strided_slice %133 {offsets = [0, 0, 0], sizes = [2, 1, 128], strides = [1, 1, 1]} : vector<2x4x128xf32> to vector<2x1x128xf32>
    %135 = vector.shape_cast %134 : vector<2x1x128xf32> to vector<2x128xf32>
    %136 = vector.extract_strided_slice %133 {offsets = [0, 1, 0], sizes = [2, 1, 128], strides = [1, 1, 1]} : vector<2x4x128xf32> to vector<2x1x128xf32>
    %137 = vector.shape_cast %136 : vector<2x1x128xf32> to vector<2x128xf32>
    %138 = arith.addf %135, %137 : vector<2x128xf32>
    %139 = vector.extract_strided_slice %133 {offsets = [0, 2, 0], sizes = [2, 1, 128], strides = [1, 1, 1]} : vector<2x4x128xf32> to vector<2x1x128xf32>
    %140 = vector.shape_cast %139 : vector<2x1x128xf32> to vector<2x128xf32>
    %141 = arith.addf %138, %140 : vector<2x128xf32>
    %142 = vector.extract_strided_slice %133 {offsets = [0, 3, 0], sizes = [2, 1, 128], strides = [1, 1, 1]} : vector<2x4x128xf32> to vector<2x1x128xf32>
    %143 = vector.shape_cast %142 : vector<2x1x128xf32> to vector<2x128xf32>
    %144 = arith.addf %141, %143 : vector<2x128xf32>
    %c0_17 = arith.constant 0 : index
    %c0_18 = arith.constant 0 : index
    %145 = vector.load %arg13[%c0_17, %c0_18] : memref<2x128xf32, #tpu.memory_space<vmem>>, vector<2x128xf32>
    tpu.vector_store %arg13[%c0_17, %c0_18], %144 {strides = array<i32>} : memref<2x128xf32, #tpu.memory_space<vmem>>, vector<2x128xf32>,
    %c0_19 = arith.constant 0 : index
    %c0_20 = arith.constant 0 : index
    %146 = vector.load %arg8[%c0_19, %c0_20] : memref<3x128xf32, #tpu.memory_space<vmem>>, vector<3x128xf32>
    "tpu.trace_start"() <{level = 10 : i32, message = "bw,cw->bc"}> : () -> ()
    %cst_21 = arith.constant dense<0.000000e+00> : vector<2x3xf32>
    %147 = tpu.matmul %144, %146, %cst_21 {dimension_numbers = #tpu.dot_dimension_numbers<[1], [1], [0], [0], [0, 0, 1, 0], [], []>} : vector<2x128xf32>, vector<3x128xf32>, vector<2x3xf32> -> vector<2x3xf32>
    "tpu.trace_stop"() : () -> ()
    %c0_22 = arith.constant 0 : index
    %c0_23 = arith.constant 0 : index
    %148 = vector.load %arg9[%c0_22, %c0_23] : memref<1x3xf32, #tpu.memory_space<vmem>>, vector<1x3xf32>
    %149 = vector.broadcast %148 : vector<1x3xf32> to vector<2x3xf32>
    %150 = arith.addf %147, %149 : vector<2x3xf32>
    %c0_24 = arith.constant 0 : index
    %c0_25 = arith.constant 0 : index
    %151 = vector.load %arg11[%c0_24, %c0_25] : memref<2x3xf32, #tpu.memory_space<vmem>>, vector<2x3xf32>
    tpu.vector_store %arg11[%c0_24, %c0_25], %150 {strides = array<i32>} : memref<2x3xf32, #tpu.memory_space<vmem>>, vector<2x3xf32>,
    %152 = arith.mulf %144, %144 : vector<2x128xf32>
    %cst_26 = arith.constant dense<0.000000e+00> : vector<2xf32>
    %153 = vector.multi_reduction <add>, %152, %cst_26 [1] : vector<2x128xf32> to vector<2xf32>
    %154 = vector.shape_cast %153 : vector<2xf32> to vector<2x1xf32>
    %155 = math.sqrt %154 : vector<2x1xf32>
    %cst_27 = arith.constant 9.99999996E-13 : f32
    %156 = vector.broadcast %cst_27 : f32 to vector<2x1xf32>
    %157 = arith.maximumf %155, %156 : vector<2x1xf32>
    %158 = vector.broadcast %157 : vector<2x1xf32> to vector<2x128xf32>
    %159 = arith.divf %144, %158 : vector<2x128xf32>
    %c0_28 = arith.constant 0 : index
    %c0_29 = arith.constant 0 : index
    %160 = vector.load %arg12[%c0_28, %c0_29] : memref<2x128xf32, #tpu.memory_space<vmem>>, vector<2x128xf32>
    tpu.vector_store %arg12[%c0_28, %c0_29], %159 {strides = array<i32>} : memref<2x128xf32, #tpu.memory_space<vmem>>, vector<2x128xf32>,
    return
  }
  func.func @transform_0(%arg0: i32) -> (i32, i32, i32) {
    %c0_i32 = arith.constant 0 : i32
    %c0_i32_0 = arith.constant 0 : i32
    %c0_i32_1 = arith.constant 0 : i32
    return %arg0, %c0_i32, %c0_i32_0 : i32, i32, i32
  }
  func.func @transform_1(%arg0: i32) -> (i32, i32) {
    %c0_i32 = arith.constant 0 : i32
    %c0_i32_0 = arith.constant 0 : i32
    %c0_i32_1 = arith.constant 0 : i32
    return %c0_i32, %c0_i32_0 : i32, i32
  }
  func.func @transform_2(%arg0: i32) -> (i32, i32) {
    %c0_i32 = arith.constant 0 : i32
    %c0_i32_0 = arith.constant 0 : i32
    %c0_i32_1 = arith.constant 0 : i32
    return %c0_i32, %c0_i32_0 : i32, i32
  }
  func.func @transform_3(%arg0: i32) -> (i32, i32) {
    %c0_i32 = arith.constant 0 : i32
    %c0_i32_0 = arith.constant 0 : i32
    %c0_i32_1 = arith.constant 0 : i32
    return %c0_i32, %c0_i32_0 : i32, i32
  }
  func.func @transform_4(%arg0: i32) -> (i32, i32) {
    %c0_i32 = arith.constant 0 : i32
    %c0_i32_0 = arith.constant 0 : i32
    %c0_i32_1 = arith.constant 0 : i32
    return %c0_i32, %c0_i32_0 : i32, i32
  }
  func.func @transform_5(%arg0: i32) -> (i32, i32) {
    %c0_i32 = arith.constant 0 : i32
    %c0_i32_0 = arith.constant 0 : i32
    %c0_i32_1 = arith.constant 0 : i32
    return %c0_i32, %c0_i32_0 : i32, i32
  }
  func.func @transform_6(%arg0: i32) -> (i32, i32) {
    %c0_i32 = arith.constant 0 : i32
    %c0_i32_0 = arith.constant 0 : i32
    %c0_i32_1 = arith.constant 0 : i32
    return %c0_i32, %c0_i32_0 : i32, i32
  }
  func.func @transform_7(%arg0: i32) -> (i32, i32) {
    %c0_i32 = arith.constant 0 : i32
    %c0_i32_0 = arith.constant 0 : i32
    %c0_i32_1 = arith.constant 0 : i32
    return %c0_i32, %c0_i32_0 : i32, i32
  }
  func.func @transform_8(%arg0: i32) -> (i32, i32) {
    %c0_i32 = arith.constant 0 : i32
    %c0_i32_0 = arith.constant 0 : i32
    %c0_i32_1 = arith.constant 0 : i32
    return %c0_i32, %c0_i32_0 : i32, i32
  }
  func.func @transform_9(%arg0: i32) -> i32 {
    %c0_i32 = arith.constant 0 : i32
    %c0_i32_0 = arith.constant 0 : i32
    return %c0_i32 : i32
  }
  func.func @transform_10(%arg0: i32) -> (i32, i32) {
    %c0_i32 = arith.constant 0 : i32
    %c0_i32_0 = arith.constant 0 : i32
    return %arg0, %c0_i32 : i32, i32
  }
  func.func @transform_11(%arg0: i32) -> (i32, i32) {
    %c0_i32 = arith.constant 0 : i32
    %c0_i32_0 = arith.constant 0 : i32
    return %arg0, %c0_i32 : i32, i32
  }
  func.func @transform_12(%arg0: i32) -> (i32, i32) {
    %c0_i32 = arith.constant 0 : i32
    %c0_i32_0 = arith.constant 0 : i32
    return %arg0, %c0_i32 : i32, i32
  }
}

</mosaic_0001>

<bundles_post_ra>
// kernel: tpu_custom_call.1
= control target key start
LH: loop header
LB: loop body
LE: loop exit
PB: predicated region body
PF: predicated region fallthrough
CT: control target
= control target key end

     0   :  { %19 = vsyncpa [#allocation4], 0  ;;  %v760_v1 = vmov 2   ;;  %v761_v2 = vmov 0   ;;  %s1017_s0 = inlined_call_operand.vmem [shape: f32[2,4,128], index: 0, kind: input, shape index: {}]   ;;  %s1018_s1 = inlined_call_operand.vmem [shape: f32[4,4], index: 1, kind: input, shape index: {}]   ;;  %s1019_s2 = inlined_call_operand.vmem [shape: f32[4,1], index: 2, kind: input, shape index: {}]   ;;  %s1020_s3 = inlined_call_operand.vmem [shape: f32[4,4], index: 3, kind: input, shape index: {}]   ;;  %s1021_s4 = inlined_call_operand.vmem [shape: f32[4,1], index: 4, kind: input, shape index: {}]   ;;  %s1022_s5 = inlined_call_operand.vmem [shape: f32[4,4], index: 5, kind: input, shape index: {}]   ;;  %s1023_s6 = inlined_call_operand.vmem [shape: f32[4,1], index: 6, kind: input, shape index: {}]   ;;  %s1024_s7 = inlined_call_operand.vmem [shape: f32[3,128], index: 7, kind: input, shape index: {}]   ;;  %s1025_s8 = inlined_call_operand.vmem [shape: f32[1,3], index: 8, kind: input, shape index: {}]   ;;  %s1026_s9 = inlined_call_operand.<no memory space> [shape: f32[1], index: 9, kind: input, shape index: {}]   ;;  %s1027_s10 = inlined_call_operand.hbm [shape: f32[2,3], index: 10, kind: output, shape index: {0}]   ;;  %s1028_s11 = inlined_call_operand.hbm [shape: f32[2,128], index: 11, kind: output, shape index: {1}]   ;;  %s1029_s12 = inlined_call_operand.hbm [shape: f32[2,128], index: 12, kind: output, shape index: {2}]  }
   0x1   :  { %v44_v0 = vld [vmem:[%s1020_s3] sm:$0xf]  ;;  %658 = vset.pattern.permute.xlu1 %v760_v1  ;;  %656 = vset.pattern.permute.xlu0 %v761_v2 }
   0x2   :  { %135 = vperm.xlu1 %658, %v44_v0   ;;  %121 = vperm.xlu0 %656, %v44_v0  }
   0x3   :  { %20 = vsyncpa [#allocation6], 0  ;;  %v43_v3 = vld [vmem:[%s1018_s1] sm:$0xf]  ;;  %v762_v4 = vmov 1   ;;  %v763_v5 = vmov 3   ;;  %v54_v9 = vlaneseq }
   0x4   :  { %v47_v6 = vld [vmem:[%s1021_s4] sm:$0xf]  ;;  %v764_v7 = vmov 0.0   ;;  %vm765_vm0 = vmmov 0   ;;  %v875_v14 = vld [vmem:[%s1017_s0 + $0x4] sm:$0xf] }
   0x5   :  { %632 = vmatprep.subr.mxu0 %v764_v7  ;;  %637 = vmatprep.subr.mxu1 %v764_v7  ;;  %v46_v8 = vld [vmem:[%s1019_s2] sm:$0xf]  ;;  %v55_v10 = vshrl.u32 %v54_v9, 7  ;;  %vm335_vm1 = vcmask 27648   ;;  %vm467_vm2 = vcmask 1041409   ;;  %vm558_vm3 = vcmask 1041408  }
   0x6   :  { %659 = vset.pattern.permute.xlu1 %v761_v2  ;;  %657 = vset.pattern.permute.xlu0 %v762_v4  ;;  %v870_v13 = vld [vmem:[%s1017_s0] sm:$0xf]  ;;  %s767_s16 = smov [#allocation7]  }
   0x7   :  { %127 = vperm.xlu0 %657, %v44_v0   ;;  %51 = vperm.xlu1 %659, %v43_v3   ;;  %v863_v11 = vsub.s32 0, %v55_v10  ;;  %v865_v12 = vsub.s32 1, %v55_v10  ;;  %v877_v15 = vsub.s32 2, %v55_v10  ;;  %v895_v22 = vsub.s32 3, %v55_v10  ;;  %s610_s17 = sshll.u32 %s767_s16, 4  ;;  %s611_s17 = int_to_ptr.vmem [resolvable:$true] %s610_s17 }
   0x8   :  { %634 = vmatprep.mubr.msk.f32.mxu0 %vm765_vm0, %v764_v7  ;;  %639 = vmatprep.mubr.msk.f32.mxu1 %vm765_vm0, %v764_v7 }
   0x9   :  { %v881_v18 = vrot.slane %v870_v13, %v863_v11  ;;  %v885_v19 = vrot.slane %v875_v14, %v863_v11  ;;  %v889_v20 = vrot.slane %v870_v13, %v865_v12  ;;  %v893_v21 = vrot.slane %v875_v14, %v865_v12 }
   0xa   :  { %v899_v23 = vrot.slane %v870_v13, %v877_v15  ;;  %v903_v24 = vrot.slane %v875_v14, %v877_v15  ;;  %v911_v31 = vrot.slane %v870_v13, %v895_v22  ;;  %v915_v32 = vrot.slane %v875_v14, %v895_v22 }
   0xb   :  { %661 = vset.pattern.permute.xlu0 %v763_v5  ;;  %660 = vset.pattern.permute.xlu1 %v762_v4 }
   0xc   :  { %143 = vperm.xlu0 %661, %v44_v0   ;;  %65 = vperm.xlu1 %660, %v43_v3  }
  0x10   :  { %664 = vset.pattern.permute.xlu0 %v761_v2  ;;  %662 = vset.pattern.permute.xlu1 %v760_v1 }
  0x11   :  { %152 = vperm.xlu0 %664, %v47_v6   ;;  %81 = vperm.xlu1 %662, %v43_v3  }
  0x15   :  { %663 = vset.pattern.permute.xlu1 %v763_v5 }
  0x16   :  { %97 = vperm.xlu1 %663, %v43_v3  }
  0x1a   :  { %665 = vset.pattern.permute.xlu1 %v761_v2 }
  0x1b   :  { %114 = vperm.xlu1 %665, %v46_v8  }
  0x1f   :  { %666 = vset.pattern.permute.xlu1 %v762_v4 }
  0x81   :  { %v136_v16 = vpop.permute.xlu1 %135  ;;  %v122_v17 = vpop.permute.xlu0 %121 }
  0x82   :  { %v124_v25 = vmul.f32 %v122_v17, %v881_v18  ;;  %v125_v26 = vmul.f32 %v122_v17, %v885_v19  ;;  %v138_v33 = vmul.f32 %v136_v16, %v899_v23  ;;  %v139_v34 = vmul.f32 %v136_v16, %v903_v24 }
  0x86   :  { %v128_v27 = vpop.permute.xlu0 %127  ;;  %v52_v28 = vpop.permute.xlu1 %51 }
  0x87   :  { %v130_v29 = vmul.f32 %v128_v27, %v889_v20  ;;  %v131_v30 = vmul.f32 %v128_v27, %v893_v21  ;;  %v62_v51 = vmul.f32 %v881_v18, %v52_v28  ;;  %v63_v52 = vmul.f32 %v885_v19, %v52_v28 }
  0x89   :  { %v132_v35 = vadd.f32 %v130_v29, %v124_v25  ;;  %v133_v36 = vadd.f32 %v131_v30, %v125_v26 }
  0x8b   :  { %v144_v37 = vpop.permute.xlu0 %143  ;;  %v66_v38 = vpop.permute.xlu1 %65  ;;  %v140_v39 = vadd.f32 %v138_v33, %v132_v35  ;;  %v141_v40 = vadd.f32 %v139_v34, %v133_v36 }
  0x8c   :  { %v146_v41 = vmul.f32 %v144_v37, %v911_v31  ;;  %v147_v42 = vmul.f32 %v144_v37, %v915_v32  ;;  %v76_v45 = vmul.f32 %v889_v20, %v66_v38  ;;  %v77_v46 = vmul.f32 %v893_v21, %v66_v38  ;;  %v45_v37 = vld [vmem:[%s1022_s5] sm:$0xf] }
  0x8d   :  { %v48_v38 = vld [vmem:[%s1023_s6] sm:$0xf] }
  0x8e   :  { %v148_v43 = vadd.f32 %v146_v41, %v140_v39  ;;  %v149_v44 = vadd.f32 %v147_v42, %v141_v40  ;;  %v78_v55 = vadd.f32 %v76_v45, %v62_v51  ;;  %v79_v56 = vadd.f32 %v77_v46, %v63_v52 }
  0x90   :  { %v153_v47 = vpop.permute.xlu0 %152  ;;  %v82_v48 = vpop.permute.xlu1 %81 }
  0x91   :  { %v155_v49 = vadd.f32 %v153_v47, %v148_v43  ;;  %v156_v50 = vadd.f32 %v153_v47, %v149_v44  ;;  %v92_v53 = vmul.f32 %v899_v23, %v82_v48  ;;  %v93_v54 = vmul.f32 %v903_v24, %v82_v48 }
  0x93   :  { %633 = vmatpush3.xpose.msra.mxu0 %v155_v49  ;;  %638 = vmatpush3.xpose.msra.mxu1 %v156_v50  ;;  %v94_v58 = vadd.f32 %v92_v53, %v78_v55  ;;  %v95_v59 = vadd.f32 %v93_v54, %v79_v56 }
  0x94   :  { %642 = vmatprep.subr.mxu0 %v764_v7 }
  0x95   :  { %v98_v57 = vpop.permute.xlu1 %97 }
  0x96   :  { %v108_v60 = vmul.f32 %v911_v31, %v98_v57  ;;  %v109_v61 = vmul.f32 %v915_v32, %v98_v57 }
  0x98   :  { %v110_v62 = vadd.f32 %v108_v60, %v94_v58  ;;  %v111_v63 = vadd.f32 %v109_v61, %v95_v59 }
  0x9a   :  { %v115_v0 = vpop.permute.xlu1 %114 }
  0x9b   :  { %v117_v3 = vadd.f32 %v115_v0, %v110_v62  ;;  %v118_v6 = vadd.f32 %v115_v0, %v111_v63 }
  0x9d   :  { %635 = vmatmul.mubr.f32.vlgmr.msra.gmra.mrb[0].mxu0 %v117_v3  ;;  %640 = vmatmul.mubr.f32.vlgmr.msra.gmra.mrb[0].mxu1 %v118_v6 }
  0x9e   :  { %644 = vmatprep.mubr.msk.f32.mxu0 %vm765_vm0, %v764_v7 }
 0x170   :  { %v261_v8 = vpop.f32.mrb[0].mxu0  ;;  %v331_v9 = vpop.f32.mrb[0].mxu1 }
 0x171   :  { %v636_v10 = vpop.f32.mrb[1].mxu0  ;;  %v641_v16 = vpop.f32.mrb[1].mxu1  ;;  %v339_v17 = vsel %vm335_vm1, %v331_v9, -inf  ;;  %v336_v25 = vsel %vm335_vm1, %v261_v8, -inf }
 0x172   :  { %340 = vmax.xlane.f32.xlu1 %v339_v17  ;;  %337 = vmax.xlane.f32.xlu0 %v336_v25 }
 0x1ff   :  { %v341_v26 = vpop.xlane.xlu1 %340  ;;  %v338_v27 = vpop.xlane.xlu0 %337 }
 0x200   :  { %v343_v28 = vsub.f32 %v331_v9, %v341_v26  ;;  %v342_v29 = vsub.f32 %v261_v8, %v338_v27 }
 0x202   :  { %v346_v30 = vmul.f32 1.442695, %v343_v28  ;;  %v344_v33 = vmul.f32 1.442695, %v342_v29 }
 0x204   :  { %676 = vpow2.f32 %v346_v30 }
 0x205   :  { %678 = vpow2.f32 %v344_v33 }
 0x20e   :  { %v677_v7 = vpop.eup %676 }
 0x20f   :  { %v679_v34 = vpop.eup %678  ;;  %v351_v35 = vsel %vm335_vm1, %v677_v7, 0.0 }
 0x210   :  { %352 = vadd.xlane.f32.xlu0 %v351_v35  ;;  %v348_v36 = vsel %vm335_vm1, %v679_v34, 0.0 }
 0x211   :  { %349 = vadd.xlane.f32.xlu1 %v348_v36 }
 0x222   :  { %165 = vperm.xlu1 %666, %v45_v37  }
 0x226   :  { %159 = vperm.xlu0 %664, %v45_v37   ;;  %667 = vset.pattern.permute.xlu1 %v760_v1 }
 0x227   :  { %173 = vperm.xlu1 %667, %v45_v37  }
 0x22a   :  { %668 = vset.pattern.permute.xlu0 %v763_v5 }
 0x22b   :  { %181 = vperm.xlu0 %668, %v45_v37   ;;  %669 = vset.pattern.permute.xlu1 %v761_v2  ;;  %v471_v2 = vld [vmem:[%s1024_s7] sm:$0x7] }
 0x22c   :  { %190 = vperm.xlu1 %669, %v48_v38   ;;  %643 = vmatpush3.xpose.msra.mxu0 %v471_v2 }
 0x22f   :  { %670 = vset.pattern.permute.xlu0 %v762_v4 }
 0x29d   :  { %v353_v39 = vpop.xlane.xlu0 %352 }
 0x29e   :  { %v350_v40 = vpop.xlane.xlu1 %349  ;;  %680 = vrcp.f32 %v353_v39 }
 0x29f   :  { %682 = vrcp.f32 %v350_v40 }
 0x2a2   :  { %v166_v45 = vpop.permute.xlu1 %165 }
 0x2a3   :  { %v168_v47 = vmul.f32 %v166_v45, %v889_v20  ;;  %v169_v49 = vmul.f32 %v166_v45, %v893_v21 }
 0x2a5   :  { %v160_v46 = vpop.permute.xlu0 %159 }
 0x2a6   :  { %v174_v48 = vpop.permute.xlu1 %173 }
 0x2a7   :  { %v177_v53 = vmul.f32 %v174_v48, %v903_v24 }
 0x2a8   :  { %v681_v41 = vpop.eup %680 }
 0x2a9   :  { %v357_v42 = vmul.f32 %v681_v41, %v677_v7  ;;  %v683_v43 = vpop.eup %682 }
 0x2aa   :  { %v355_v44 = vmul.f32 %v683_v43, %v679_v34  ;;  %v182_v51 = vpop.permute.xlu0 %181 }
 0x2ab   :  { %383 = vperm.xlu0 %670, %v357_v42   ;;  %365 = vperm.xlu1 %669, %v357_v42   ;;  %v191_v54 = vpop.permute.xlu1 %190  ;;  %v184_v56 = vmul.f32 %v182_v51, %v911_v31  ;;  %v185_v20 = vmul.f32 %v182_v51, %v915_v32 }
 0x2af   :  { %672 = vset.pattern.permute.xlu0 %v760_v1  ;;  %360 = vperm.xlu1 %669, %v355_v44  }
 0x2b0   :  { %403 = vperm.xlu0 %672, %v357_v42  }
 0x2b3   :  { %671 = vset.pattern.permute.xlu1 %v762_v4  ;;  %v162_v4 = vmul.f32 %v160_v46, %v881_v18 }
 0x2b4   :  { %675 = vset.pattern.permute.xlu0 %v763_v5  ;;  %379 = vperm.xlu1 %671, %v355_v44  }
 0x2b5   :  { %419 = vperm.xlu0 %675, %v355_v44   ;;  %v170_v50 = vadd.f32 %v168_v47, %v162_v4 }
 0x2b8   :  { %673 = vset.pattern.permute.xlu1 %v760_v1  ;;  %v163_v1 = vmul.f32 %v160_v46, %v885_v19 }
 0x2b9   :  { %399 = vperm.xlu1 %673, %v355_v44  }
 0x2ba   :  { %v171_v52 = vadd.f32 %v169_v49, %v163_v1 }
 0x2bc   :  { %v179_v57 = vadd.f32 %v177_v53, %v171_v52 }
 0x2bd   :  { %674 = vset.pattern.permute.xlu1 %v763_v5  ;;  %v176_v5 = vmul.f32 %v174_v48, %v899_v23 }
 0x2be   :  { %423 = vperm.xlu1 %674, %v357_v42   ;;  %v187_v21 = vadd.f32 %v185_v20, %v179_v57 }
 0x2bf   :  { %v178_v55 = vadd.f32 %v176_v5, %v170_v50 }
 0x2c0   :  { %v194_v61 = vadd.f32 %v191_v54, %v187_v21 }
 0x2c1   :  { %v186_v58 = vadd.f32 %v184_v56, %v178_v55 }
 0x2c2   :  { %v375_v3 = vrot.slane %v194_v61, %v863_v11  ;;  %v393_v31 = vrot.slane %v194_v61, %v865_v12  ;;  %v413_v10 = vrot.slane %v194_v61, %v877_v15 }
 0x2c3   :  { %v193_v19 = vadd.f32 %v191_v54, %v186_v58 }
 0x2c5   :  { %v389_v63 = vrot.slane %v193_v19, %v865_v12  ;;  %v371_v24 = vrot.slane %v193_v19, %v863_v11  ;;  %v409_v32 = vrot.slane %v193_v19, %v877_v15  ;;  %v429_v26 = vrot.slane %v193_v19, %v895_v22 }
 0x2c6   :  { %v439_v11 = vstv %s1026_s9  ;;  %v433_v12 = vrot.slane %v194_v61, %v895_v22  ;;  %s766_s9 = smov [#allocation5]  }
 0x2c7   :  { %s600_s15 = sshll.u32 %s766_s9, 4  ;;  %s601_s15 = int_to_ptr.vmem [resolvable:$true] %s600_s15 }
 0x2c8   :  { %s690_s18 = scalar_lea.vmem %s601_s15, 32  ;;  %p695_p1 = scmp.lt.s32.totalorder %s601_s15, %s601_s15 }
 0x2c9   :  { %p691_p0 = scmp.ne.s32.totalorder %s601_s15, %s690_s18  ;;  %p696_p2 = scmp.lt.s32.totalorder %s690_s18, %s690_s18 }
 0x2cb   :  { %p697_p3 = por %p696_p2, %p695_p1 }
 0x2cd   :  { %p698_p4 = pnand %p697_p3, %p691_p0 }
 0x32a   :  { %v366_v18 = vpop.permute.xlu1 %365  ;;  %v384_v59 = vpop.permute.xlu0 %383 }
 0x32b   :  { %v377_v8 = vmul.f32 %v375_v3, %v366_v18  ;;  %v395_v9 = vmul.f32 %v393_v31, %v384_v59 }
 0x32d   :  { %v397_v33 = vadd.f32 %v395_v9, %v377_v8 }
 0x32e   :  { %v361_v60 = vpop.permute.xlu1 %360 }
 0x32f   :  { %v404_v62 = vpop.permute.xlu0 %403  ;;  %v376_v6 = vmul.f32 %v371_v24, %v361_v60 }
 0x330   :  { %v415_v28 = vmul.f32 %v413_v10, %v404_v62 }
 0x332   :  { %v417_v35 = vadd.f32 %v415_v28, %v397_v33 }
 0x333   :  { %v380_v23 = vpop.permute.xlu1 %379 }
 0x334   :  { %v394_v0 = vmul.f32 %v389_v63, %v380_v23  ;;  %v420_v16 = vpop.permute.xlu0 %419 }
 0x335   :  { %v434_v29 = vmul.f32 %v429_v26, %v420_v16 }
 0x336   :  { %v396_v25 = vadd.f32 %v394_v0, %v376_v6 }
 0x338   :  { %v400_v17 = vpop.permute.xlu1 %399 }
 0x339   :  { %v414_v27 = vmul.f32 %v409_v32, %v400_v17 }
 0x33b   :  { %v416_v30 = vadd.f32 %v414_v27, %v396_v25 }
 0x33d   :  { %v436_v7 = vadd.f32 %v434_v29, %v416_v30  ;;  %v424_v34 = vpop.permute.xlu1 %423 }
 0x33e   :  { %v435_v15 = vmul.f32 %v433_v12, %v424_v34 }
 0x33f   :  { %v440_v36 = vmul.f32 %v439_v11, %v436_v7 }
 0x340   :  { %v437_v37 = vadd.f32 %v435_v15, %v417_v35 }
 0x341   :  { %v442_v38 = vadd.f32 %v440_v36, %v870_v13 }
 0x342   :  { %v441_v39 = vmul.f32 %v439_v11, %v437_v37 }
 0x343   :  { %v446_v40 = vrot.slane %v442_v38, 1  ;;  %v452_v44 = vrot.slane %v442_v38, 2  ;;  %v458_v22 = vrot.slane %v442_v38, 3 }
 0x344   :  { %v443_v41 = vadd.f32 %v441_v39, %v875_v14 }
 0x345   :  { %v450_v42 = vadd.f32 %v446_v40, %v442_v38 }
 0x346   :  { %v447_v43 = vrot.slane %v443_v41, 1  ;;  %v453_v45 = vrot.slane %v443_v41, 2  ;;  %v459_v4 = vrot.slane %v443_v41, 3 }
 0x347   :  { %v456_v46 = vadd.f32 %v452_v44, %v450_v42 }
 0x348   :  { %v451_v2 = vadd.f32 %v447_v43, %v443_v41 }
 0x349   :  { %v462_v48 = vadd.f32 %v458_v22, %v456_v46 }
 0x34a   :  { %v457_v47 = vadd.f32 %v453_v45, %v451_v2 }
 0x34b   :  { %v551_v5 = vmul.f32 %v462_v48, %v462_v48 }
 0x34c   :  { %v463_v49 = vadd.f32 %v459_v4, %v457_v47 }
 0x34e   :  { %v466_v1 = vrot.slane %v463_v49, 7  ;;  %v552_v50 = vmul.f32 %v463_v49, %v463_v49 }
 0x350   :  { %v468_v13 = vsel %vm467_vm2, %v466_v1, %v462_v48  ;;  %v555_v51 = vrot.slane %v552_v50, 7 }
 0x351   :  { %645 = vmatmul.mubr.f32.vlgmr.msra.gmra.mrb[2].mxu0 %v468_v13  ;;  %470 = vst [vmem:[#allocation7] sm:$0x3] %v468_v13 }
 0x352   :  { %v556_v14 = vsel %vm467_vm2, %v555_v51, %v551_v5 }
 0x353   :  { %v559_v52 = vsel %vm558_vm3, %v556_v14, 0.0 }
 0x354   :  { %560 = vadd.xlane.f32.xlu1 %v559_v52 }
 0x3e1   :  { %v561_v53 = vpop.xlane.xlu1 %560 }
 0x3e2   :  { %684 = vrsqrt.f32 %v561_v53  ;;  %vm564_vm4 = vcmp.eq.f32.partialorder %v561_v53, inf  ;;  %v567_v56 = vand.u32 2147483648, %v561_v53  ;;  %vm566_vm5 = vcmp.eq.f32.partialorder %v561_v53, 0.0 }
 0x3ec   :  { %v685_v54 = vpop.eup %684 }
 0x3ed   :  { %v563_v55 = vmul.f32 %v685_v54, %v561_v53 }
 0x3ef   :  { %v565_v57 = vsel %vm564_vm4, %v561_v53, %v563_v55 }
 0x3f0   :  { %v568_v20 = vsel %vm566_vm5, %v567_v56, %v565_v57 }
 0x3f1   :  { %v569_v18 = vmax.f32 %v568_v20, 1e-12 }
 0x3f3   :  { %v571_v58 = vrot.slane %v569_v18, 1  ;;  %686 = vrcp.f32 %v569_v18 }
 0x3f5   :  { %688 = vrcp.f32 %v571_v58 }
 0x3fd   :  { %v687_v59 = vpop.eup %686 }
 0x3fe   :  { %v575_v19 = vmul.f32 %v687_v59, %v462_v48 }
 0x3ff   :  { %v689_v21 = vpop.eup %688 }
 0x400   :  { %v577_v60 = vmul.f32 %v689_v21, %v463_v49 }
 0x402   :  { %v580_v61 = vrot.slane %v577_v60, 7 }
 0x404   :  { %v581_v62 = vsel %vm467_vm2, %v580_v61, %v575_v19 }
 0x405   :  { %583 = vst [vmem:[#allocation5] sm:$0x3] %v581_v62 }
 0x406   :  { %701 = shalt.err (!%p698_p4)
}
 0x407   :  { %s702_s21 = scalar_lea.hbm %s1028_s11, 32 }
 0x408   :  { %p703_p5 = scmp.ne.s32.totalorder %s1028_s11, %s702_s21  ;;  %p706_p6 = scmp.lt.u32.totalorder %s702_s21, %s1028_s11 }
 0x40a   :  { %p708_p7 = pnand %p706_p6, %p703_p5 }
 0x40c   :  { %711 = shalt.err (!%p708_p7)
}
 0x40d   :  { %603 = dma.vmem_to_hbm [thread:$0]  %s601_s15, 32, %s1028_s11, [#allocation6]  }
 0x40e   :  { %s712_s26 = scalar_lea.vmem %s611_s17, 32  ;;  %p717_p9 = scmp.lt.s32.totalorder %s611_s17, %s611_s17 }
 0x40f   :  { %p713_p8 = scmp.ne.s32.totalorder %s611_s17, %s712_s26  ;;  %p718_p10 = scmp.lt.s32.totalorder %s712_s26, %s712_s26 }
 0x411   :  { %p719_p11 = por %p718_p10, %p717_p9 }
 0x413   :  { %p720_p12 = pnand %p719_p11, %p713_p8 }
 0x415   :  { %723 = shalt.err (!%p720_p12)
}
 0x416   :  { %s724_s27 = scalar_lea.hbm %s1029_s12, 32 }
 0x417   :  { %p725_p13 = scmp.ne.s32.totalorder %s1029_s12, %s724_s27  ;;  %p728_p0 = scmp.lt.u32.totalorder %s724_s27, %s1029_s12 }
 0x419   :  { %p730_p1 = pnand %p728_p0, %p725_p13 }
 0x41b   :  { %733 = shalt.err (!%p730_p1)
}
 0x41c   :  { %613 = dma.vmem_to_hbm [thread:$0]  %s611_s17, 32, %s1029_s12, [#allocation6]   ;;  %v625_v23 = vld [vmem:[%s1025_s8] ss:$0 sm:$0xff]  ;;  %vm549_vm6 = vcmask 17408  }
 0x41d   :  { %s768_s7 = smov [#allocation3]  }
 0x41e   :  { %s590_s14 = sshll.u32 %s768_s7, 4  ;;  %s591_s14 = int_to_ptr.vmem [resolvable:$true] %s590_s14 }
 0x41f   :  { %s734_s9 = scalar_lea.vmem %s591_s14, 32  ;;  %p739_p3 = scmp.lt.s32.totalorder %s591_s14, %s591_s14 }
 0x420   :  { %p735_p2 = scmp.ne.s32.totalorder %s591_s14, %s734_s9  ;;  %p740_p4 = scmp.lt.s32.totalorder %s734_s9, %s734_s9 }
 0x422   :  { %p741_p5 = por %p740_p4, %p739_p3 }
 0x424   :  { %v545_v63 = vpop.f32.mrb[2].mxu0  ;;  %p742_p6 = pnand %p741_p5, %p735_p2 }
 0x425   :  { %v546_v24 = vadd.f32 %v625_v23, %v545_v63  ;;  %v646_v0 = vpop.f32.mrb[3].mxu0 }
 0x427   :  { %550 = vst.msk [vmem:[#allocation3] sm:$0x3] %vm549_vm6, %v546_v24 }
 0x428   :  { %745 = shalt.err (!%p742_p6)
}
 0x429   :  { %s746_s16 = scalar_lea.hbm %s1027_s10, 32 }
 0x42a   :  { %p747_p7 = scmp.ne.s32.totalorder %s1027_s10, %s746_s16  ;;  %p750_p8 = scmp.lt.u32.totalorder %s746_s16, %s1027_s10 }
 0x42c   :  { %p752_p9 = pnand %p750_p8, %p747_p7 }
 0x42e   :  { %755 = shalt.err (!%p752_p9)
}
 0x42f   :  { %593 = dma.vmem_to_hbm [thread:$0]  %s591_s14, 32, %s1027_s10, [#allocation4]  }
 0x430   :  { %756 = dma.done.wait [#allocation4], 32  }
 0x431   :  { %757 = vsyncadd [#allocation4], 4294967264 }
 0x432   :  { %758 = dma.done.wait [#allocation6], 64  }
 0x433   :  { %759 = vsyncadd [#allocation6], 4294967232 }
 0x434   :  { %623 = vsyncpa [#allocation4], 1 }
 0x435   :  { %624 = vsyncpa [#allocation6], 1 }

</bundles_post_ra>
